<compile_context>
chip_gen: v6e
topology: v6e:2x2x1
jax: 0.10.0
libtpu: 0.0.40
codegen_flags: <defaults>
</compile_context>

<pallas_src>
import functools

import jax
import jax.numpy as jnp
from jax.experimental import pallas as pl
from jax.experimental.pallas import tpu as pltpu


# ---------------------------------------------------------------------------
# Routing (select_experts) -- tiny, plain JAX glue around the kernel.
# ---------------------------------------------------------------------------
def select_experts(router_logits, top_k, renormalize):
    probs = jax.nn.softmax(router_logits.astype(jnp.float32), axis=-1)
    topk_w, topk_ids = jax.lax.top_k(probs, top_k)
    if renormalize:
        topk_w = topk_w / jnp.sum(topk_w, axis=-1, keepdims=True)
    return topk_w, topk_ids


# ---------------------------------------------------------------------------
# Generation-aware sizing helpers.
# ---------------------------------------------------------------------------
def _vmem_budget_bytes():
    """~75% of per-core VMEM capacity (96 MiB v5e/v6e, 48 MiB v7x), w/ fallback."""
    cap = 64 * 1024 * 1024
    try:
        cap = int(pltpu.get_tpu_info().vmem_capacity_bytes)
    except Exception:
        pass
    return (cap * 3) // 4


def _largest_divisor_tile(full, target, align):
    """Largest `align`-aligned divisor of `full` that is <= target, else `full`."""
    if full <= align or full % align != 0:
        return full
    t = (min(target, full) // align) * align
    while t >= align:
        if full % t == 0:
            return t
        t -= align
    return full


def _choose_inter_tile(hidden, inter, itemsize, budget_bytes, token_tile):
    """Pick the intermediate tile so double-buffered weight blocks fit the budget."""
    if inter <= 128:
        return inter
    # Double-buffered weights per step: w13 (H, 2*tI) + w2 (tI, H) -> 6*H*tI*itemsize.
    # Fixed: double-buffered x + out blocks, f32 accumulator, small rw block.
    fixed = (4 * token_tile * hidden * itemsize      # x + out, double buffered
             + 4 * token_tile * hidden               # f32 accumulator
             + 2 * token_tile * 1024)                # rw block (padded to 128 lanes)
    avail = max(budget_bytes - fixed, budget_bytes // 8)
    max_ti = avail // (6 * hidden * itemsize)
    target = int(min(max(max_ti, 128), 2048))
    return _largest_divisor_tile(inter, target, 128)


def _pick_token_tile(total_rows, target):
    """Token (row) tile: multiple of 8, shrunk for small (decode) batches."""
    target = max(8, (int(target) // 8) * 8)
    rounded = ((total_rows + 7) // 8) * 8
    return min(target, rounded)


# ---------------------------------------------------------------------------
# One-time weight re-layout (hoisted out of the per-call forward).
# ---------------------------------------------------------------------------
def prepare_moe_weights(w13, w2, *, tile_inter=None, token_tile_hint=256):
    """Returns (w13_fused, w2_t, tile_inter).

    w13_fused: (E, H, 2I) with per-I-tile interleaving [gate_i | up_i], so one
               contiguous (H, 2*tile_inter) block feeds a single MXU matmul.
    w2_t:      (E, I, H) lane-dense down projection.
    """
    E, two_I, H = w13.shape
    I = two_I // 2
    if tile_inter is None:
        itemsize = jnp.dtype(w13.dtype).itemsize
        tile_inter = _choose_inter_tile(H, I, itemsize, _vmem_budget_bytes(),
                                        token_tile_hint)
    assert I % tile_inter == 0
    n_i = I // tile_inter
    w13_t = jnp.transpose(w13, (0, 2, 1))                     # (E, H, 2I)  [gate | up]
    w13_t = w13_t.reshape(E, H, 2, n_i, tile_inter)
    w13_t = jnp.transpose(w13_t, (0, 1, 3, 2, 4))             # (E, H, n_i, 2, tI)
    w13_fused = w13_t.reshape(E, H, 2 * I)                    # per tile: [gate_i | up_i]
    w2_t = jnp.transpose(w2, (0, 2, 1))                       # (E, I, H)
    return w13_fused, w2_t, int(tile_inter)


# ---------------------------------------------------------------------------
# Grouped MoE kernel.
# ---------------------------------------------------------------------------
def _grouped_moe_kernel(te_ref, tr_ref, ta_ref,               # scalar prefetch (SMEM)
                        x_ref, w13_ref, w2_ref, rw_ref,       # VMEM input blocks
                        o_ref,                                # VMEM output block
                        acc_ref,                              # VMEM f32 scratch (tT, H)
                        *, tile_inter):
    m = pl.program_id(0)
    i = pl.program_id(1)
    n_i = pl.num_programs(1)

    @pl.when(i == 0)
    def _():
        acc_ref[...] = jnp.zeros_like(acc_ref)

    # Padding tiles (tile_active == 0) skip all MXU/VPU work; their index maps
    # also freeze every input block index so they cost no DMA.
    @pl.when(ta_ref[m] > 0)
    def _():
        x = x_ref[...]                                        # (tT, H), input dtype
        # Fused gate+up projection: one DMA stream, one wide MXU matmul.
        gu = jnp.dot(x, w13_ref[...], preferred_element_type=jnp.float32)  # (tT, 2*tI)
        g = gu[:, :tile_inter]
        u = gu[:, tile_inter:]
        h = (g * jax.nn.sigmoid(g)) * u                       # SiLU(gate) * up, f32
        # Fold the per-row routing weight into the (tT, tI) intermediate (cheaper
        # than scaling the (tT, H) accumulator path every step).
        h = h * rw_ref[...]                                   # (tT, 1) f32 broadcast
        acc_ref[...] += jnp.dot(h.astype(x.dtype), w2_ref[...],
                                preferred_element_type=jnp.float32)

    @pl.when(i == n_i - 1)
    def _():
        o_ref[...] = acc_ref[...].astype(o_ref.dtype)


# ---------------------------------------------------------------------------
# Forward.
# ---------------------------------------------------------------------------
def fused_moe_forward(hidden_states, router_logits, w13_fused, w2_t, *,
                      top_k, tile_inter, renormalize=True, tile_tokens=256,
                      vmem_limit_bytes=None):
    T, H = hidden_states.shape
    E, I, H2 = w2_t.shape
    assert H2 == H and w13_fused.shape == (E, H, 2 * I)
    tI = int(tile_inter)
    assert I % tI == 0
    n_i = I // tI
    K = int(top_k)
    TK = T * K
    tT = _pick_token_tile(TK, tile_tokens)

    # ---- routing ------------------------------------------------------------
    topk_w, topk_ids = select_experts(router_logits, K, renormalize)

    # ---- megablox-style grouping: sort expanded (token, expert) assignments by
    # expert; pad each expert's group to a multiple of the token tile so every
    # row tile belongs to exactly one expert.
    flat_expert = topk_ids.reshape(-1).astype(jnp.int32)               # (TK,)
    flat_token = jnp.arange(TK, dtype=jnp.int32) // K
    flat_w = topk_w.reshape(-1).astype(jnp.float32)

    sort_idx = jnp.argsort(flat_expert)
    sorted_expert = flat_expert[sort_idx]
    sorted_token = flat_token[sort_idx]
    sorted_w = flat_w[sort_idx]

    group_sizes = jnp.bincount(flat_expert, length=E).astype(jnp.int32)
    group_start = (jnp.cumsum(group_sizes) - group_sizes).astype(jnp.int32)
    tiles_per_e = (group_sizes + tT - 1) // tT
    cum_tiles = jnp.cumsum(tiles_per_e).astype(jnp.int32)              # inclusive
    pad_start = ((cum_tiles - tiles_per_e) * tT).astype(jnp.int32)
    num_active = cum_tiles[-1]

    # Static bound: sum_e ceil(g_e/tT) <= #nonempty experts + floor(TK/tT).
    num_tiles = min(E, TK) + TK // tT
    m_pad = num_tiles * tT

    # Destination padded row of every sorted assignment.
    dest = pad_start[sorted_expert] + (jnp.arange(TK, dtype=jnp.int32)
                                       - group_start[sorted_expert])

    x_pad = jnp.zeros((m_pad, H), hidden_states.dtype).at[dest].set(
        hidden_states[sorted_token])
    rw_pad = jnp.zeros((m_pad, 1), jnp.float32).at[dest, 0].set(sorted_w)

    # Per-tile metadata (scalar prefetch): expert block, x/rw row block, active.
    tile_idx = jnp.arange(num_tiles, dtype=jnp.int32)
    expert_of = jnp.searchsorted(cum_tiles, tile_idx, side='right').astype(jnp.int32)
    last_e = jnp.searchsorted(cum_tiles, num_active - 1, side='right').astype(jnp.int32)
    active = tile_idx < num_active
    tile_expert = jnp.where(active, jnp.minimum(expert_of, E - 1),
                            jnp.minimum(last_e, E - 1)).astype(jnp.int32)
    tile_rowblk = jnp.where(active, tile_idx, num_active - 1).astype(jnp.int32)
    tile_active = active.astype(jnp.int32)

    # ---- index maps (scalar-prefetch refs are positional trailing args) -----
    def x_map(m, i, te, tr, ta):
        return (tr[m], 0)

    def w13_map(m, i, te, tr, ta):
        a = ta[m]            # padding tiles freeze the i index -> no weight DMA
        return (te[m], 0, i * a + (n_i - 1) * (1 - a))

    def w2_map(m, i, te, tr, ta):
        a = ta[m]
        return (te[m], i * a + (n_i - 1) * (1 - a), 0)

    def rw_map(m, i, te, tr, ta):
        return (tr[m], 0)

    def out_map(m, i, te, tr, ta):
        return (m, 0)

    if vmem_limit_bytes is None:
        vmem_limit_bytes = _vmem_budget_bytes()

    grid_spec = pltpu.PrefetchScalarGridSpec(
        num_scalar_prefetch=3,
        grid=(num_tiles, n_i),
        in_specs=[
            pl.BlockSpec((tT, H), x_map),
            pl.BlockSpec((None, H, 2 * tI), w13_map),
            pl.BlockSpec((None, tI, H), w2_map),
            pl.BlockSpec((tT, 1), rw_map),
        ],
        out_specs=pl.BlockSpec((tT, H), out_map),
        scratch_shapes=[pltpu.VMEM((tT, H), jnp.float32)],
    )

    out_pad = pl.pallas_call(
        functools.partial(_grouped_moe_kernel, tile_inter=tI),
        out_shape=jax.ShapeDtypeStruct((m_pad, H), hidden_states.dtype),
        grid_spec=grid_spec,
        compiler_params=pltpu.CompilerParams(
            dimension_semantics=("arbitrary", "arbitrary"),
            vmem_limit_bytes=int(vmem_limit_bytes)),
    )(tile_expert, tile_rowblk, tile_active, x_pad, w13_fused, w2_t, rw_pad)

    # ---- un-sort and combine the top_k (already weighted) expert outputs ----
    inv = jnp.argsort(sort_idx)
    dest_orig = dest[inv]                                     # padded row per (t, k)
    out = out_pad[dest_orig].astype(jnp.float32).reshape(T, K, H).sum(axis=1)
    return out.astype(hidden_states.dtype)


# ---------------------------------------------------------------------------
# Pure-JAX reference for validation.
# ---------------------------------------------------------------------------
def _reference(hidden_states, router_logits, w13, w2, *, top_k, renormalize=True):
    T, H = hidden_states.shape
    E, two_I, _ = w13.shape
    I = two_I // 2
    topk_w, topk_ids = select_experts(router_logits, top_k, renormalize)
    x = hidden_states.astype(jnp.float32)
    out = jnp.zeros((T, H), jnp.float32)
    for e in range(E):
        gate_up = x @ w13[e].astype(jnp.float32).T
        gate, up = gate_up[:, :I], gate_up[:, I:]
        h = (gate * jax.nn.sigmoid(gate)) * up
        oe = h @ w2[e].astype(jnp.float32).T
        we = jnp.sum(jnp.where(topk_ids == e, topk_w, 0.0), axis=-1, keepdims=True)
        out = out + we * oe
    return out.astype(hidden_states.dtype)


if __name__ == "__main__":
    # Small shapes consistent with the module: T tokens, hidden H, intermediate I,
    # E experts, top_k routed experts per token.
    T, H, I, E, TOP_K = 16, 32, 16, 8, 2
    key = jax.random.PRNGKey(0)
    k1, k2, k3, k4 = jax.random.split(key, 4)

    hidden_states = jax.random.normal(k1, (T, H), dtype=jnp.float32)
    router_logits = jax.random.normal(k2, (T, E), dtype=jnp.float32)
    # Module parameter shapes: w13 (E, 2I, H), w2 (E, H, I).
    w13 = jax.random.normal(k3, (E, 2 * I, H), dtype=jnp.float32) * 0.1
    w2 = jax.random.normal(k4, (E, H, I), dtype=jnp.float32) * 0.1

    # One-time weight re-layout, hoisted out of the forward (perf-review item).
    w13_fused, w2_t, tile_inter = prepare_moe_weights(w13, w2)

    ref = _reference(hidden_states, router_logits, w13, w2,
                     top_k=TOP_K, renormalize=True)

    # tile_tokens=8 forces several row tiles plus padding tiles, exercising the
    # grouped index maps, the active-tile gate and the accumulator init/finalize.
    out = fused_moe_forward(hidden_states, router_logits, w13_fused, w2_t,
                            top_k=TOP_K, renormalize=True,
                            tile_inter=tile_inter, tile_tokens=8)
    out = jax.block_until_ready(out)
    assert jnp.allclose(out, ref, atol=1e-4, rtol=1e-4), "mismatch vs reference (tT=8)"

    # Default (large) token-tile path.
    out2 = fused_moe_forward(hidden_states, router_logits, w13_fused, w2_t,
                             top_k=TOP_K, renormalize=True, tile_inter=tile_inter)
    out2 = jax.block_until_ready(out2)
    assert jnp.allclose(out2, ref, atol=1e-4, rtol=1e-4), "mismatch vs reference (default)"

    print("KERNEL_OK")
</pallas_src>

<mosaic_0001>
module attributes {stable_mosaic.version = 11 : i64} {
  func.func @_grouped_moe_kernel(%arg0: i32, %arg1: i32, %arg2: memref<12xi32, #tpu.memory_space<smem>>, %arg3: memref<12xi32, #tpu.memory_space<smem>>, %arg4: memref<12xi32, #tpu.memory_space<smem>>, %arg5: memref<8x32xf32, #tpu.memory_space<vmem>>, %arg6: memref<1x32x32xf32, #tpu.memory_space<vmem>>, %arg7: memref<1x16x32xf32, #tpu.memory_space<vmem>>, %arg8: memref<8x1xf32, #tpu.memory_space<vmem>>, %arg9: memref<8x32xf32, #tpu.memory_space<vmem>>, %arg10: memref<8x32xf32, #tpu.memory_space<vmem>>) attributes {dimension_semantics = [#tpu.dimension_semantics<arbitrary>, #tpu.dimension_semantics<arbitrary>], iteration_bounds = array<i64: 12, 1>, scalar_prefetch = 3 : i64, scratch_operands = 1 : i64, tpu.core_type = #tpu.core_type<tc>, window_params = [{transform_indices = @transform_0, window_bounds = array<i64: 8, 32>}, {transform_indices = @transform_1, window_bounds = array<i64: 1, 32, 32>}, {transform_indices = @transform_2, window_bounds = array<i64: 1, 16, 32>}, {transform_indices = @transform_3, window_bounds = array<i64: 8, 1>}, {transform_indices = @transform_4, window_bounds = array<i64: 8, 32>}]} {
    %c0_i32 = arith.constant 0 : i32
    %0 = arith.cmpi eq, %arg1, %c0_i32 : i32
    %1 = arith.extui %0 : i1 to i32
    %c0_i32_0 = arith.constant 0 : i32
    %2 = arith.cmpi ne, %1, %c0_i32_0 : i32
    scf.if %2 {
      %cst = arith.constant 0.000000e+00 : f32
      %11 = vector.broadcast %cst : f32 to vector<8x32xf32>
      %c0 = arith.constant 0 : index
      %c0_5 = arith.constant 0 : index
      %12 = vector.load %arg10[%c0, %c0_5] : memref<8x32xf32, #tpu.memory_space<vmem>>, vector<8x32xf32>
      tpu.vector_store %arg10[%c0, %c0_5], %11 {strides = array<i32>} : memref<8x32xf32, #tpu.memory_space<vmem>>, vector<8x32xf32>,
    } else {
    }
    %3 = arith.index_cast %arg0 : i32 to index
    %4 = memref.load %arg4[%3] : memref<12xi32, #tpu.memory_space<smem>>
    %c0_i32_1 = arith.constant 0 : i32
    %5 = arith.cmpi sgt, %4, %c0_i32_1 : i32
    %6 = arith.extui %5 : i1 to i32
    %c0_i32_2 = arith.constant 0 : i32
    %7 = arith.cmpi ne, %6, %c0_i32_2 : i32
    scf.if %7 {
      %c0 = arith.constant 0 : index
      %c0_5 = arith.constant 0 : index
      %11 = vector.load %arg5[%c0, %c0_5] : memref<8x32xf32, #tpu.memory_space<vmem>>, vector<8x32xf32>
      %c0_6 = arith.constant 0 : index
      %c0_7 = arith.constant 0 : index
      %c0_8 = arith.constant 0 : index
      %12 = vector.load %arg6[%c0_6, %c0_7, %c0_8] : memref<1x32x32xf32, #tpu.memory_space<vmem>>, vector<1x32x32xf32>
      %13 = vector.shape_cast %12 : vector<1x32x32xf32> to vector<32x32xf32>
      %cst = arith.constant dense<0.000000e+00> : vector<8x32xf32>
      %14 = tpu.matmul %11, %13, %cst {dimension_numbers = #tpu.dot_dimension_numbers<[1], [0], [0], [1], [0, 0, 1, 1], [], []>} : vector<8x32xf32>, vector<32x32xf32>, vector<8x32xf32> -> vector<8x32xf32>
      %15 = vector.extract_strided_slice %14 {offsets = [0, 0], sizes = [8, 16], strides = [1, 1]} : vector<8x32xf32> to vector<8x16xf32>
      %16 = vector.extract_strided_slice %14 {offsets = [0, 16], sizes = [8, 16], strides = [1, 1]} : vector<8x32xf32> to vector<8x16xf32>
      %17 = arith.negf %15 : vector<8x16xf32>
      %18 = math.exp %17 : vector<8x16xf32>
      %cst_9 = arith.constant 1.000000e+00 : f32
      %19 = vector.broadcast %cst_9 : f32 to vector<8x16xf32>
      %20 = arith.addf %19, %18 : vector<8x16xf32>
      %21 = arith.divf %19, %20 : vector<8x16xf32>
      %22 = arith.mulf %15, %21 : vector<8x16xf32>
      %23 = arith.mulf %22, %16 : vector<8x16xf32>
      %c0_10 = arith.constant 0 : index
      %c0_11 = arith.constant 0 : index
      %24 = vector.load %arg8[%c0_10, %c0_11] : memref<8x1xf32, #tpu.memory_space<vmem>>, vector<8x1xf32>
      %25 = vector.broadcast %24 : vector<8x1xf32> to vector<8x16xf32>
      %26 = arith.mulf %23, %25 : vector<8x16xf32>
      %c0_12 = arith.constant 0 : index
      %c0_13 = arith.constant 0 : index
      %27 = vector.load %arg10[%c0_12, %c0_13] : memref<8x32xf32, #tpu.memory_space<vmem>>, vector<8x32xf32>
      %c0_14 = arith.constant 0 : index
      %c0_15 = arith.constant 0 : index
      %c0_16 = arith.constant 0 : index
      %28 = vector.load %arg7[%c0_14, %c0_15, %c0_16] : memref<1x16x32xf32, #tpu.memory_space<vmem>>, vector<1x16x32xf32>
      %29 = vector.shape_cast %28 : vector<1x16x32xf32> to vector<16x32xf32>
      %cst_17 = arith.constant dense<0.000000e+00> : vector<8x32xf32>
      %30 = tpu.matmul %26, %29, %cst_17 {dimension_numbers = #tpu.dot_dimension_numbers<[1], [0], [0], [1], [0, 0, 1, 1], [], []>} : vector<8x16xf32>, vector<16x32xf32>, vector<8x32xf32> -> vector<8x32xf32>
      %31 = arith.addf %27, %30 : vector<8x32xf32>
      %c0_18 = arith.constant 0 : index
      %c0_19 = arith.constant 0 : index
      %32 = vector.load %arg10[%c0_18, %c0_19] : memref<8x32xf32, #tpu.memory_space<vmem>>, vector<8x32xf32>
      tpu.vector_store %arg10[%c0_18, %c0_19], %31 {strides = array<i32>} : memref<8x32xf32, #tpu.memory_space<vmem>>, vector<8x32xf32>,
    } else {
    }
    %c0_i32_3 = arith.constant 0 : i32
    %8 = arith.cmpi eq, %arg1, %c0_i32_3 : i32
    %9 = arith.extui %8 : i1 to i32
    %c0_i32_4 = arith.constant 0 : i32
    %10 = arith.cmpi ne, %9, %c0_i32_4 : i32
    scf.if %10 {
      %c0 = arith.constant 0 : index
      %c0_5 = arith.constant 0 : index
      %11 = vector.load %arg10[%c0, %c0_5] : memref<8x32xf32, #tpu.memory_space<vmem>>, vector<8x32xf32>
      %c0_6 = arith.constant 0 : index
      %c0_7 = arith.constant 0 : index
      %12 = vector.load %arg9[%c0_6, %c0_7] : memref<8x32xf32, #tpu.memory_space<vmem>>, vector<8x32xf32>
      tpu.vector_store %arg9[%c0_6, %c0_7], %11 {strides = array<i32>} : memref<8x32xf32, #tpu.memory_space<vmem>>, vector<8x32xf32>,
    } else {
    }
    return
  }
  func.func @transform_0(%arg0: i32, %arg1: i32, %arg2: memref<12xi32, #tpu.memory_space<smem>>, %arg3: memref<12xi32, #tpu.memory_space<smem>>, %arg4: memref<12xi32, #tpu.memory_space<smem>>) -> (i32, i32) {
    %0 = arith.index_cast %arg0 : i32 to index
    %1 = memref.load %arg3[%0] : memref<12xi32, #tpu.memory_space<smem>>
    %c0_i32 = arith.constant 0 : i32
    %c0_i32_0 = arith.constant 0 : i32
    return %1, %c0_i32 : i32, i32
  }
  func.func @transform_1(%arg0: i32, %arg1: i32, %arg2: memref<12xi32, #tpu.memory_space<smem>>, %arg3: memref<12xi32, #tpu.memory_space<smem>>, %arg4: memref<12xi32, #tpu.memory_space<smem>>) -> (i32, i32, i32) {
    %0 = arith.index_cast %arg0 : i32 to index
    %1 = memref.load %arg4[%0] : memref<12xi32, #tpu.memory_space<smem>>
    %2 = arith.index_cast %arg0 : i32 to index
    %3 = memref.load %arg2[%2] : memref<12xi32, #tpu.memory_space<smem>>
    %4 = arith.muli %arg1, %1 : i32
    %c1_i32 = arith.constant 1 : i32
    %5 = arith.subi %c1_i32, %1 : i32
    %c0_i32 = arith.constant 0 : i32
    %6 = arith.muli %c0_i32, %5 : i32
    %7 = arith.addi %4, %6 : i32
    %c0_i32_0 = arith.constant 0 : i32
    %c0_i32_1 = arith.constant 0 : i32
    return %3, %c0_i32_0, %7 : i32, i32, i32
  }
  func.func @transform_2(%arg0: i32, %arg1: i32, %arg2: memref<12xi32, #tpu.memory_space<smem>>, %arg3: memref<12xi32, #tpu.memory_space<smem>>, %arg4: memref<12xi32, #tpu.memory_space<smem>>) -> (i32, i32, i32) {
    %0 = arith.index_cast %arg0 : i32 to index
    %1 = memref.load %arg4[%0] : memref<12xi32, #tpu.memory_space<smem>>
    %2 = arith.index_cast %arg0 : i32 to index
    %3 = memref.load %arg2[%2] : memref<12xi32, #tpu.memory_space<smem>>
    %4 = arith.muli %arg1, %1 : i32
    %c1_i32 = arith.constant 1 : i32
    %5 = arith.subi %c1_i32, %1 : i32
    %c0_i32 = arith.constant 0 : i32
    %6 = arith.muli %c0_i32, %5 : i32
    %7 = arith.addi %4, %6 : i32
    %c0_i32_0 = arith.constant 0 : i32
    %c0_i32_1 = arith.constant 0 : i32
    return %3, %7, %c0_i32_0 : i32, i32, i32
  }
  func.func @transform_3(%arg0: i32, %arg1: i32, %arg2: memref<12xi32, #tpu.memory_space<smem>>, %arg3: memref<12xi32, #tpu.memory_space<smem>>, %arg4: memref<12xi32, #tpu.memory_space<smem>>) -> (i32, i32) {
    %0 = arith.index_cast %arg0 : i32 to index
    %1 = memref.load %arg3[%0] : memref<12xi32, #tpu.memory_space<smem>>
    %c0_i32 = arith.constant 0 : i32
    %c0_i32_0 = arith.constant 0 : i32
    return %1, %c0_i32 : i32, i32
  }
  func.func @transform_4(%arg0: i32, %arg1: i32, %arg2: memref<12xi32, #tpu.memory_space<smem>>, %arg3: memref<12xi32, #tpu.memory_space<smem>>, %arg4: memref<12xi32, #tpu.memory_space<smem>>) -> (i32, i32) {
    %c0_i32 = arith.constant 0 : i32
    %c0_i32_0 = arith.constant 0 : i32
    return %arg0, %c0_i32 : i32, i32
  }
}

</mosaic_0001>

<bundles_post_ra>
// kernel: tpu_custom_call.1
= control target key start
LH: loop header
LB: loop body
LE: loop exit
PB: predicated region body
PF: predicated region fallthrough
CT: control target
= control target key end

     0   :  { %s1123_s0 = inlined_call_operand.vmem [shape: s32[12], index: 0, kind: input, shape index: {}]   ;;  %s1124_s3 = inlined_call_operand.vmem [shape: f32[96,32], index: 3, kind: input, shape index: {}]   ;;  %s1125_s4 = inlined_call_operand.hbm [shape: f32[8,32,32], index: 4, kind: input, shape index: {}]   ;;  %s1126_s5 = inlined_call_operand.vmem [shape: f32[8,16,32], index: 5, kind: input, shape index: {}]   ;;  %s1127_s6 = inlined_call_operand.vmem [shape: f32[96,1], index: 6, kind: input, shape index: {}]   ;;  %s1128_s7 = inlined_call_operand.vmem [shape: f32[96,32], index: 7, kind: output, shape index: {}]   ;;  %s1129_s1 = inlined_call_operand.vmem [shape: s32[12], index: 1, kind: input, shape index: {}]   ;;  %s1130_s2 = inlined_call_operand.vmem [shape: s32[12], index: 2, kind: input, shape index: {}]  }
   0x1   :  { %s12_s26 = sshll.u32 %s1123_s0, 4  ;;  %s16_s29 = sshll.u32 %s1129_s1, 4  ;;  %s13_s26 = int_to_ptr.vmem [resolvable:$true] %s12_s26  ;;  %s17_s29 = int_to_ptr.vmem [resolvable:$true] %s16_s29 }
   0x2   :  { %s798_s30 = scalar_lea.vmem %s13_s26, 16  ;;  %p803_p1 = scmp.lt.s32.totalorder %s13_s26, %s13_s26 }
   0x3   :  { %p799_p0 = scmp.ne.s32.totalorder %s13_s26, %s798_s30  ;;  %p804_p2 = scmp.lt.s32.totalorder %s798_s30, %s798_s30 }
   0x5   :  { %p805_p3 = por %p804_p2, %p803_p1 }
   0x7   :  { %p806_p4 = pnand %p805_p3, %p799_p0 }
   0x9   :  { %809 = shalt.err (!%p806_p4)  }
   0xa   :  { %s916_s8 = smov [#allocation4]   ;;  %s810_s9 = scalar_lea.vmem %s17_s29, 16 }
   0xb   :  { %15 = dma.vmem_to_smem %s13_s26, 16, %s916_s8, [#allocation3] }
   0xc   :  { %p811_p5 = scmp.ne.s32.totalorder %s17_s29, %s810_s9  ;;  %p815_p6 = scmp.lt.s32.totalorder %s17_s29, %s17_s29 }
   0xd   :  { %p816_p7 = scmp.lt.s32.totalorder %s810_s9, %s810_s9 }
   0xf   :  { %p817_p8 = por %p816_p7, %p815_p6 }
  0x11   :  { %p818_p9 = pnand %p817_p8, %p811_p5 }
  0x13   :  { %821 = shalt.err (!%p818_p9)  }
  0x14   :  { %s917_s0 = smov [#allocation5]   ;;  %s20_s11 = sshll.u32 %s1130_s2, 4  ;;  %s21_s11 = int_to_ptr.vmem [resolvable:$true] %s20_s11 }
  0x15   :  { %19 = dma.vmem_to_smem %s17_s29, 16, %s917_s0, [#allocation3] }
  0x16   :  { %s822_s12 = scalar_lea.vmem %s21_s11, 16  ;;  %p827_p11 = scmp.lt.s32.totalorder %s21_s11, %s21_s11 }
  0x17   :  { %p823_p10 = scmp.ne.s32.totalorder %s21_s11, %s822_s12  ;;  %p828_p12 = scmp.lt.s32.totalorder %s822_s12, %s822_s12 }
  0x19   :  { %p829_p13 = por %p828_p12, %p827_p11 }
  0x1b   :  { %p830_p0 = pnand %p829_p13, %p823_p10 }
  0x1d   :  { %833 = shalt.err (!%p830_p0)  }
  0x1e   :  { %s918_s13 = smov [#allocation6]  }
  0x1f   :  { %23 = dma.vmem_to_smem %s21_s11, 16, %s918_s13, [#allocation3] }
  0x20   :  { %886 = dma.done.wait [#allocation3], 48 }
  0x21   :  { %887 = vsyncadd [#allocation3], 4294967248 }
  0x22   :  { %25 = sfence }
  0x23   :  { %26 = vsyncpa [#allocation8], 0 }
  0x24   :  { %28 = vsyncpa [#allocation8 + $0x1], 0  ;;  %s976_s14 = smov 0   ;;  %s978_s15 = smov 0  }
  0x25   :  { %s980_s2 = smov 0   ;;  %s982_s16 = smov 0  }
  0x26   :  { %s984_s17 = smov 0   ;;  %s986_s18 = smov 0  }
  0x27 LB: > { %s46_s19 = sadd.s32 1, %s910_s17  ;;  %s676_s20 = sadd.s32 4294967295, %s914_s18   ;;  %s914_s18 = sphi %s986_s18, %s34_s18   ;;  %s910_s17 = sphi %s984_s17, %s1141_s17   ;;  %s906_s16 = sphi %s982_s16, %s1140_s16   ;;  %s902_s2 = sphi %s980_s2, %s1139_s2   ;;  %s898_s15 = sphi %s978_s15, %s1138_s15   ;;  %s894_s14 = sphi %s976_s14, %s1137_s14  }
  0x28   : > { %p48_p1 = scmp.ge.s32.totalorder %s46_s19, 12  ;;  %s79_s21 = sld [smem:[#allocation4 + %s910_s17]] }
  0x29   : > { %p96_p2 = scmp.ne.s32.totalorder %s902_s2, %s898_s15  ;;  %p97_p3 = scmp.eq.s32.totalorder %s914_s18, 0 }
  0x2a   : > { %s1143_s19 = smov (%p48_p1, %s46_s19), 0  ;;  %p102_p4 = scmp.ne.s32.totalorder %s898_s15, %s894_s14 }
  0x2b   : > { %s82_s22 = sld [smem:[#allocation4 + %s1143_s19]]  ;;  %p103_p5 = scmp.eq.s32.totalorder %s676_s20, 0 }
  0x2c   : > { %s223_s24 = sand.u32 1, %s902_s2   ;;  %p98_p7 = por %p97_p3, %p96_p2 }
  0x2d   : > { %p1014_p6 = por %p103_p5, %p102_p4  ;;  %s89_s25 = sadd.s32 1, %s902_s2 }
  0x2e   : > { %p734_p8 = scmp.lt.s32.totalorder %s914_s18, 12  ;;  %s680_s27 = sshll.u32 %s223_s24, 5 }
  0x2f   : > { %s1132_s23 = scalar_select %p1014_p6, 1, 0 }
  0x30   : > { %p1021_p10 = pnand %p734_p8, %p98_p7  ;;  %p683_p11 = scmp.ge.s32.totalorder %s914_s18, 1 }
  0x31   : > { %s84_s26 = ssub.s32 %s79_s21, %s82_s22  ;;  %p274_p12 = scmp.lt.s32.totalorder %s914_s18, 13 }
  0x32   : > { %p87_p9 = scmp.eq.s32.totalorder %s84_s26, 0  ;;  %s227_s0 = scalar_lea.vmem [#allocation7], %s680_s27 }
  0x33   : > { %s724_s29 = scalar_select %p98_p7, [#allocation4], [#allocation9] }
  0x34   : > { %s1026_s30 = scalar_select %p87_p9, %s902_s2, %s89_s25  }
  0x35   : > { %s725_s8 = scalar_select %p98_p7, %s910_s17, 0 }
  0x36   : > { %s1145_s29 = smov (!%p734_p8, %s724_s29), [#allocation10]  ;;  %s238_s1 = sshll.u32 %s227_s0, 4  ;;  %s1035_s1 = int_to_ptr.vmem [resolvable:$true] %s238_s1 }
  0x37   : > { %s1147_s8 = smov (!%p734_p8, %s725_s8), 0  ;;  %p1031_p13 = pnand %p683_p11, %p274_p12 }
  0x38   : > { %s229_s9 = sld [smem:[%s1145_s29 + %s1147_s8]]  ;;  %s1042_s20 = scalar_lea.sflag [#allocation8], %s223_s24 }
  0x39   : > { %s1134_s10 = scalar_select %p1031_p13, 1, 0 }
  0x3a   : > { %p836_p1 = pneg %p1021_p10  ;;  %s839_s26 = scalar_lea.hbm %s1125_s4, 4096 }
  0x3e   : > { %s696_s11 = sshll.u32 %s229_s9, 9 }
  0x3f   : > { %s1040_s14 = scalar_lea.hbm %s1125_s4, %s696_s11 }
  0x40   : > { %s834_s21 = scalar_lea.hbm %s1040_s14, 512  ;;  %p840_p4 = scmp.lt.s32.totalorder %s1040_s14, %s1125_s4 }
  0x41   : > { %p835_p0 = scmp.ne.s32.totalorder %s1040_s14, %s834_s21  ;;  %p841_p5 = scmp.lt.s32.totalorder %s839_s26, %s834_s21 }
  0x43   : > { %p837_p2 = pnand %p836_p1, %p835_p0  ;;  %p842_p7 = por %p841_p5, %p840_p4 }
  0x45   : > { %p838_p3 = pneg %p837_p2 }
  0x47   : > { %p843_p8 = pnand %p842_p7, %p838_p3 }
  0x49   : > { %846 = shalt.err (!%p843_p8)
}
  0x4a   : > { %s847_s24 = scalar_lea.vmem %s1035_s1, 512  ;;  %s919_s8 = smov [#allocation7]  }
  0x4b   : > { %p848_p9 = scmp.ne.s32.totalorder %s1035_s1, %s847_s24  ;;  %s852_s9 = sshll.u32 %s919_s8, 4  ;;  %s853_s9 = int_to_ptr.vmem [resolvable:$false] %s852_s9 }
  0x4c   : > { %s854_s0 = scalar_lea.vmem %s853_s9, 1024  ;;  %p855_p0 = scmp.lt.s32.totalorder %s1035_s1, %s853_s9 }
  0x4d   : > { %p850_p11 = pnand %p848_p9, %p836_p1  ;;  %p856_p2 = scmp.lt.s32.totalorder %s854_s0, %s847_s24 }
  0x4f   : > { %p851_p12 = pneg %p850_p11  ;;  %p857_p6 = por %p856_p2, %p855_p0 }
  0x51   : > { %p858_p13 = pnand %p857_p6, %p851_p12 }
  0x53   : > { %861 = shalt.err (!%p858_p13)
}
  0x54   : > { %s920_s11 = smov 128   ;;  %s921_s12 = smov 8  }
  0x55   : > { %733 = dma.hbm_to_vmem [thread:$0]  (!%p1021_p10), %s1040_s14, 512, %s1035_s1, %s1042_s20, %s920_s11, %s920_s11, %s921_s12  }
  0x56   : > { %p1135_p1 = scmp.ne.s32.totalorder %s1134_s10, 0 }
  0x57   : > { %s280_s13 = sand.u32 (!%p1135_p1), 1, %s898_s15   ;;  %p1136_p6 = scmp.ne.s32.totalorder (!%p1135_p1), %s1132_s23, 0 }
  0x58   : > { %278 = sbr.rel (%p1135_p1) target bundleno = 638 (0x27e), region = 36  ;;  %s684_s21 = sshll.u32 (!%p1135_p1), %s280_s13, 5 }
  0x59   : > { %s281_s22 = scalar_lea.sflag (!%p1135_p1), [#allocation8], %s280_s13  ;;  %s1066_s25 = scalar_lea.vmem (!%p1135_p1), [#allocation7], %s684_s21 }
  0x5d   : > { %889 = dma.done.wait (%p1136_p6), %s281_s22, 512  }
  0x5e   : > { %891 = vsyncadd (%p1136_p6), %s281_s22, 4294966784  ;;  %vm369_vm0 = vcmask 261120   ;;  %s330_s28 = sld [smem:[#allocation5 + %s906_s16]]  ;;  %p361_p10 = scmp.lt.s32.totalorder %s906_s16, 11  ;;  %v922_v0 = vmov 0.0  }
  0x5f   : > { %370 = vst.msk [vmem:[#allocation2] sm:$0xff] %vm369_vm0, %v922_v0  ;;  %s340_s1 = sld [smem:[#allocation4 + %s906_s16]] }
  0x60   : > { %s355_s10 = sld [smem:[#allocation5 + %s906_s16]] }
  0x61   : > { %s371_s14 = sld [smem:[#allocation6 + %s906_s16]]  ;;  %s1149_s16 = smov (!%p361_p10, %s906_s16), 11 }
  0x62   : > { %s689_s20 = sshll.u32 %s1149_s16, 3 }
  0x63   : > { %s1082_s27 = scalar_lea.vmem %s1128_s7, %s689_s20 }
  0x64   : > { %p331_p13 = scmp.lt.s32.totalorder %s330_s28, 11 }
  0x65   : > { %p343_p3 = scmp.lt.s32.totalorder %s340_s1, 7 }
  0x66   : > { %s1151_s28 = smov (!%p331_p13, %s330_s28), 11  ;;  %p356_p4 = scmp.lt.s32.totalorder %s355_s10, 11 }
  0x67   : > { %s1153_s1 = smov (!%p343_p3, %s340_s1), 7  ;;  %s685_s29 = sshll.u32 %s1151_s28, 3 }
  0x68   : > { %s334_s9 = scalar_lea.vmem %s1124_s3, %s685_s29  ;;  %s697_s0 = sshll.u32 %s1153_s1, 4 }
  0x69   : > { %s1090_s13 = scalar_lea.vmem %s1126_s5, %s697_s0  ;;  %s1155_s10 = smov (!%p356_p4, %s355_s10), 11 }
  0x6a   : > { %s688_s16 = sshll.u32 %s1155_s10, 3  ;;  %p690_p5 = scmp.le.s32.totalorder %s371_s14, 0 }
  0x6b   : > { %s359_s20 = scalar_lea.vmem %s1127_s6, %s688_s16  ;;  %s926_s28 = smov (!%p690_p5), 112  }
  0x6c   : > { %375 = sbr.rel (%p690_p5) target bundleno = 630 (0x276), region = 48 }
  0x71   : > { %v380_v1 = vld [vmem:[%s1066_s25 + $0x18] sm:$0xff]  ;;  %v923_v2 = vmov 0.0   ;;  %v379_v3 = vld [vmem:[%s1066_s25 + $0x10] sm:$0xff]  ;;  %vm924_vm1 = vmmov 0   ;;  %v925_v5 = vmov 0   ;;  %v378_v6 = vld [vmem:[%s1066_s25 + $0x8] sm:$0xff] }
  0x72   : > { %706 = vmatprep.subr.mxu0 %v923_v2  ;;  %714 = vmatprep.mubr.msk.f32.mxu0 %vm924_vm1, %v923_v2  ;;  %v467_v4 = vld [vmem:[%s359_s20] sm:$0xff]  ;;  %v377_v7 = vld [vmem:[%s1066_s25] sm:$0xff]  ;;  %vm477_vm2 = vcmask 130048  }
  0x73   : > { %707 = vmatpush3.msra.mxu0 %v380_v1  ;;  %793 = vset.pattern.permute.xlu0 %v925_v5  ;;  %v376_v8 = vld [vmem:[%s334_s9] sm:$0xff]  ;;  %v476_v9 = vld [vmem:[%s1090_s13 + $0x8] sm:$0xff] }
  0x74   : > { %708 = vmatprep.subr.mxu0 %v923_v2  ;;  %470 = vperm.xlu0 %793, %v467_v4   ;;  %v475_v10 = vld [vmem:[%s1090_s13] sm:$0xff] }
  0x75   : > { %709 = vmatpush3.msra.mxu0 %v379_v3  ;;  %717 = vmatprep.subr.mxu1 %v923_v2  ;;  %v474_v22 = vld [vmem:[#allocation2] sm:$0xff] }
  0x76   : > { %710 = vmatprep.subr.mxu0 %v923_v2  ;;  %721 = vmatprep.mubr.msk.f32.mxu1 %vm924_vm1, %v923_v2 }
  0x77   : > { %711 = vmatpush3.msra.mxu0 %v378_v6  ;;  %718 = vmatpush3.msra.mxu1 %v476_v9 }
  0x78   : > { %712 = vmatprep.subr.mxu0 %v923_v2  ;;  %719 = vmatprep.subr.mxu1 %v923_v2 }
  0x79   : > { %713 = vmatpush3.msra.mxu0 %v377_v7  ;;  %720 = vmatpush3.msra.mxu1 %v475_v10 }
  0x7a   : > { %715 = vmatmul.mubr.msk.f32.vlgmr.msra.gmra.mxu0 %vm369_vm0, %v376_v8 }
  0xef   : > { %v471_v16 = vpop.permute.xlu0 %470 }
 0x13a   : > { %v451_v11 = vpop.f32.mrf.mxu0 }
 0x13b   : > { %463 = vrot.lane.b32.xlu0 %v451_v11, %s926_s28  ;;  %v692_v13 = vmul.f32 -1.442695, %v451_v11 }
 0x13c   : > { %v716_v12 = vpop.f32.mrf.mxu0 }
 0x13d   : > { %794 = vpow2.f32 %v692_v13 }
 0x14a   : > { %v795_v14 = vpop.eup %794 }
 0x14b   : > { %v458_v15 = vadd.f32 1.0, %v795_v14 }
 0x14d   : > { %796 = vrcp.f32 %v458_v15 }
 0x15a   : > { %v797_v17 = vpop.eup %796 }
 0x15b   : > { %v461_v18 = vmul.f32 %v797_v17, %v451_v11 }
 0x1ad   : > { %v464_v19 = vpop.permute.xlu0 %463 }
 0x1ae   : > { %v466_v20 = vmul.f32 %v464_v19, %v461_v18 }
 0x1b0   : > { %v473_v21 = vmul.f32 %v471_v16, %v466_v20 }
 0x1b2   : > { %722 = vmatmul.mubr.msk.f32.vlgmr.msra.gmra.mxu1 %vm477_vm2, %v473_v21 }
 0x272   : > { %v547_v23 = vpop.f32.mrf.mxu1 }
 0x273   : > { %v551_v24 = vadd.f32 %v547_v23, %v474_v22 }
 0x274   : > { %v723_v25 = vpop.f32.mrf.mxu1 }
 0x275   : > { %552 = vst.msk [vmem:[#allocation2] sm:$0xff] %vm369_vm0, %v551_v24 }
 0x276 PF:  {}
 0x27c   : > { %v556_v26 = vld [vmem:[#allocation2] sm:$0xff] }
 0x27d   : > { %558 = vst.msk [vmem:[%s1082_s27] sm:$0xff] %vm369_vm0, %v556_v26 }
 0x27e PF: > { %s34_s18 = sadd.s32 1, %s914_s18   ;;  %s1137_s14 = smov %s898_s15 }
 0x27f   : > { %p31_p7 = scmp.ge.s32.totalorder %s34_s18, 14   ;;  %s1138_s15 = smov %s902_s2 }
 0x280   : > { %s1139_s2 = smov %s1026_s30  ;;  %s1140_s16 = smov %s910_s17 }
 0x281   : > { %s1141_s17 = smov %s1143_s19  ;;  %33 = sbr.rel (!%p31_p7) target bundleno = 39 (0x27), region = 97 }
 0x286   :  { %578 = vsyncpa [#allocation8], 1 }
 0x287   :  { %580 = vsyncpa [#allocation8 + $0x1], 1 }

</bundles_post_ra>
